<compile_context>
chip_gen: v6e
topology: v6e:2x2x1
jax: 0.10.0
libtpu: 0.0.40
codegen_flags: <defaults>
</compile_context>

<pallas_src>
import functools

import jax
import jax.numpy as jnp
import numpy as np
from jax.experimental import pallas as pl
from jax.experimental.pallas import tpu as pltpu  # noqa: F401  (kept for future scratch/DMA use)


# --------------------------- fused LSTM + FC kernel ---------------------------
def _fused_lstm_fc_kernel(data_ref, w_ref, out_ref, *, num_layers, seq_len,
                          batch, hidden, xpad):
    """Everything VMEM-resident; weights/bias/x arrive as two pre-packed slabs.

    data_ref : (T*B + L + 1, DCOLS) f32  -- rows [0,T*B): x (time-major, lane-padded),
               rows [T*B, T*B+L): per-layer bias (b_ih+b_hh), row T*B+L: fc bias (padded).
    w_ref    : (XPAD + 2*L*H, 4H) bf16   -- [W_ih0^T (row-padded to XPAD); W_hh0^T;
               [W_ih_l^T; W_hh_l^T] for l>=1; fc_W^T (lane-padded to 4H)].
    out_ref  : (B, 4H) f32               -- first O lanes valid (sliced in wrapper).
    """
    L, T, B, H = num_layers, seq_len, batch, hidden
    G = 4 * H
    f32, bf16 = jnp.float32, jnp.bfloat16

    data = data_ref[...]
    w = w_ref[...]

    x = data[:T * B, :xpad]                                        # (T*B, XPAD) f32
    bias = [data[T * B + l:T * B + l + 1, :G] for l in range(L)]   # (1, G) f32 each
    fcb = data[T * B + L:T * B + L + 1, :G]                        # (1, G) f32

    w_ih0 = w[0:xpad, :]                                           # (XPAD, G) bf16
    w_hh0 = w[xpad:xpad + H, :]                                    # (H, G)
    off = xpad + H
    w_cat = [w[off + 2 * H * (l - 1):off + 2 * H * l, :] for l in range(1, L)]
    w_fc = w[off + 2 * H * (L - 1):off + 2 * H * (L - 1) + H, :]   # (H, G)

    # Hoisted layer-0 input projection for all T timesteps: one MXU pass.
    xg0 = jnp.dot(x.astype(bf16), w_ih0, preferred_element_type=f32) + bias[0]

    def cell_update(sg, tg, c, base):
        i = sg[:, base:base + H]
        f = sg[:, base + H:base + 2 * H]
        g = tg[:, base + 2 * H:base + 3 * H]
        o = sg[:, base + 3 * H:base + 4 * H]
        return f * c + i * g, o

    if L == 2:
        # ---- diagonal wavefront: layer-0 step s fused with layer-1 step s-1 ----
        w_cat1 = w_cat[0]                                          # [W_ih1^T ; W_hh1^T] (2H, G)
        w_rec = jnp.concatenate(                                   # (2H, 2G) bf16
            [jnp.concatenate([w_hh0, jnp.zeros((H, G), bf16)], axis=0), w_cat1],
            axis=1)
        # Hoisted (time-independent) layer-1 bias glued onto xg0 so the per-step
        # gate correction is a single row-slice + add.
        xgb = jnp.concatenate(
            [xg0, jnp.broadcast_to(bias[1], (T * B, G))], axis=1)  # (T*B, 2G) f32

        # s = 0: layer-0 step 0 only (h_{-1}=c_{-1}=0 -> no recurrent matmul, no f*c).
        g = xg0[0:B, :]
        sg = jax.nn.sigmoid(g)
        tg = jnp.tanh(g)
        c0 = sg[:, 0:H] * tg[:, 2 * H:3 * H]
        h0 = sg[:, 3 * H:4 * H] * jnp.tanh(c0)
        h1 = jnp.zeros((B, H), f32)
        c1 = jnp.zeros((B, H), f32)

        for s in range(1, T):                                      # fully unrolled (T static/small)
            hh = jnp.concatenate([h0, h1], axis=1).astype(bf16)    # (B, 2H)
            gates = (jnp.dot(hh, w_rec, preferred_element_type=f32)
                     + xgb[s * B:(s + 1) * B, :])                  # (B, 2G)
            sg = jax.nn.sigmoid(gates)                             # full-vector EUP pass
            tg = jnp.tanh(gates)
            c0, o0 = cell_update(sg, tg, c0, 0)                    # layer 0, step s
            c1, o1 = cell_update(sg, tg, c1, G)                    # layer 1, step s-1
            tc = jnp.tanh(jnp.concatenate([c0, c1], axis=1))       # single cell-tanh push
            h0 = o0 * tc[:, :H]
            h1 = o1 * tc[:, H:]

        # s = T: drain -- layer-1 step T-1.
        hh = jnp.concatenate([h0, h1], axis=1).astype(bf16)
        gates = jnp.dot(hh, w_cat1, preferred_element_type=f32) + bias[1]
        sg = jax.nn.sigmoid(gates)
        tg = jnp.tanh(gates)
        c1, o1 = cell_update(sg, tg, c1, 0)
        h_last = o1 * jnp.tanh(c1)
    else:
        # ---- generic fallback (num_layers != 2): sequential layers ----
        seq = None
        h_last = None
        for l in range(L):
            if l == 0:
                xg, w_hh = xg0, w_hh0
            else:
                xg = (jnp.dot(seq, w_cat[l - 1][:H, :], preferred_element_type=f32)
                      + bias[l])
                w_hh = w_cat[l - 1][H:, :]
            h = jnp.zeros((B, H), f32)
            c = jnp.zeros((B, H), f32)
            hs = []
            for t in range(T):
                g = xg[t * B:(t + 1) * B, :]
                if t > 0:
                    g = g + jnp.dot(h.astype(bf16), w_hh, preferred_element_type=f32)
                sg = jax.nn.sigmoid(g)
                tg = jnp.tanh(g)
                c, o = cell_update(sg, tg, c, 0)
                h = o * jnp.tanh(c)
                if l < L - 1:
                    hs.append(h.astype(bf16))
            if l < L - 1:
                seq = jnp.concatenate(hs, axis=0)                  # (T*B, H), register/VMEM resident
            h_last = h

    # Final Linear (weights/bias lane-padded to 4H -> unmasked lane-dense store).
    out_ref[...] = jnp.dot(h_last.astype(bf16), w_fc, preferred_element_type=f32) + fcb


# ------------------------------ module wrapper --------------------------------
def disaster_lstm_forward(params, x):
    """x: [B, T, input_size] (batch_first, like the PyTorch module) -> [B, output_size]."""
    B, T, Din = x.shape
    L = len(params["layers"])
    H = params["layers"][0][1].shape[1]            # w_hh: (4H, H) -> H
    O = params["fc_w"].shape[0]
    G = 4 * H
    XPAD = ((Din + 127) // 128) * 128              # lane-pad x / W_ih0^T rows
    DCOLS = max(G, XPAD)
    assert O <= G, "TODO(synk): tile the final Linear for output_size > 4*hidden_size"

    f32, bf16 = jnp.float32, jnp.bfloat16

    # --- bf16 weight slab (lane width 4H), built once; kernel slices static offsets ---
    w_ih0, w_hh0, _, _ = params["layers"][0]
    blocks = [
        jnp.zeros((XPAD, G), f32).at[:Din, :].set(w_ih0.T.astype(f32)),   # W_ih0^T row-padded
        w_hh0.T.astype(f32),                                              # W_hh0^T
    ]
    for l in range(1, L):
        w_ih, w_hh, _, _ = params["layers"][l]
        blocks.append(jnp.concatenate([w_ih.T, w_hh.T], axis=0).astype(f32))  # [W_ih^T; W_hh^T]
    blocks.append(jnp.zeros((H, G), f32).at[:, :O].set(params["fc_w"].T.astype(f32)))
    w_slab = jnp.concatenate(blocks, axis=0).astype(bf16)          # (XPAD + 2*L*H, G)

    # --- f32 data slab: x (time-major, lane-padded), per-layer biases, fc bias ---
    x_tm = jnp.transpose(x, (1, 0, 2)).reshape(T * B, Din).astype(f32)
    rows = [jnp.zeros((T * B, DCOLS), f32).at[:, :Din].set(x_tm)]
    for (_, _, b_ih, b_hh) in params["layers"]:
        rows.append(jnp.zeros((1, DCOLS), f32).at[0, :G].set((b_ih + b_hh).astype(f32)))
    rows.append(jnp.zeros((1, DCOLS), f32).at[0, :O].set(params["fc_b"].astype(f32)))
    data_slab = jnp.concatenate(rows, axis=0)                      # (T*B + L + 1, DCOLS)

    kernel = functools.partial(
        _fused_lstm_fc_kernel,
        num_layers=L, seq_len=T, batch=B, hidden=H, xpad=XPAD)

    # TODO(synk): for large batch on v7x, add a grid axis over batch with
    # dimension_semantics=("parallel",) so the recurrence is sharded across both
    # TensorCores; for large T, tile the hoisted projection with pltpu.emit_pipeline.
    out = pl.pallas_call(
        kernel,
        out_shape=jax.ShapeDtypeStruct((B, G), f32),
    )(data_slab, w_slab)
    return out[:, :O]


# ----------------------------- parameter init ---------------------------------
def init_disaster_lstm_params(key, input_size, hidden_size, num_layers, output_size):
    """Deterministic init matching PyTorch parameter shapes (uniform +-1/sqrt(H))."""
    params = {"layers": []}
    bound = 1.0 / np.sqrt(hidden_size)
    for layer in range(num_layers):
        in_sz = input_size if layer == 0 else hidden_size
        key, k1, k2, k3, k4 = jax.random.split(key, 5)
        w_ih = jax.random.uniform(k1, (4 * hidden_size, in_sz), jnp.float32, -bound, bound)
        w_hh = jax.random.uniform(k2, (4 * hidden_size, hidden_size), jnp.float32, -bound, bound)
        b_ih = jax.random.uniform(k3, (4 * hidden_size,), jnp.float32, -bound, bound)
        b_hh = jax.random.uniform(k4, (4 * hidden_size,), jnp.float32, -bound, bound)
        params["layers"].append((w_ih, w_hh, b_ih, b_hh))
    key, k5, k6 = jax.random.split(key, 3)
    params["fc_w"] = jax.random.uniform(k5, (output_size, hidden_size), jnp.float32,
                                        -bound, bound)
    params["fc_b"] = jax.random.uniform(k6, (output_size,), jnp.float32, -bound, bound)
    return params


# --------------------------- pure-JAX reference -------------------------------
def _reference_forward(params, x):
    B = x.shape[0]
    H = params["layers"][0][1].shape[1]
    seq = jnp.transpose(x, (1, 0, 2)).astype(jnp.float32)     # [T, B, D]
    for (w_ih, w_hh, b_ih, b_hh) in params["layers"]:
        def step(carry, x_t):
            h, c = carry
            gates = x_t @ w_ih.T + h @ w_hh.T + b_ih + b_hh
            i, f, g, o = jnp.split(gates, 4, axis=-1)
            c = jax.nn.sigmoid(f) * c + jax.nn.sigmoid(i) * jnp.tanh(g)
            h = jax.nn.sigmoid(o) * jnp.tanh(c)
            return (h, c), h
        h0 = jnp.zeros((B, H), jnp.float32)
        c0 = jnp.zeros((B, H), jnp.float32)
        _, seq = jax.lax.scan(step, (h0, c0), seq)
    return seq[-1] @ params["fc_w"].T + params["fc_b"]


# ------------------------------------ main -------------------------------------
if __name__ == "__main__":
    input_size, hidden_size, num_layers, output_size = 8, 32, 2, 3
    batch, seq_len = 2, 8

    key = jax.random.PRNGKey(0)
    key, kx = jax.random.split(key)
    x = jax.random.normal(kx, (batch, seq_len, input_size), jnp.float32)

    params = init_disaster_lstm_params(key, input_size, hidden_size,
                                       num_layers, output_size)

    fwd = jax.jit(disaster_lstm_forward)
    out = jax.block_until_ready(fwd(params, x))

    ref = jax.block_until_ready(_reference_forward(params, x))
    # bf16 MXU operands (f32 accumulation / gate math) -> relaxed tolerance.
    np.testing.assert_allclose(np.asarray(out), np.asarray(ref), rtol=2e-2, atol=1e-2)

    print("KERNEL_OK")
</pallas_src>

<mosaic_0001>
module attributes {stable_mosaic.version = 11 : i64} {
  func.func @_fused_lstm_fc_kernel(%arg0: memref<19x128xf32, #tpu.memory_space<vmem>>, %arg1: memref<256x128xbf16, #tpu.memory_space<vmem>>, %arg2: memref<2x128xf32, #tpu.memory_space<vmem>>) attributes {dimension_semantics = [], scalar_prefetch = 0 : i64, scratch_operands = 0 : i64, tpu.core_type = #tpu.core_type<tc>} {
    %c0 = arith.constant 0 : index
    %c0_0 = arith.constant 0 : index
    %0 = vector.load %arg0[%c0, %c0_0] : memref<19x128xf32, #tpu.memory_space<vmem>>, vector<19x128xf32>
    %c0_1 = arith.constant 0 : index
    %c0_2 = arith.constant 0 : index
    %1 = vector.load %arg1[%c0_1, %c0_2] : memref<256x128xbf16, #tpu.memory_space<vmem>>, vector<256x128xbf16>
    %2 = vector.extract_strided_slice %0 {offsets = [0, 0], sizes = [16, 128], strides = [1, 1]} : vector<19x128xf32> to vector<16x128xf32>
    %3 = vector.extract_strided_slice %0 {offsets = [16, 0], sizes = [1, 128], strides = [1, 1]} : vector<19x128xf32> to vector<1x128xf32>
    %4 = vector.extract_strided_slice %0 {offsets = [17, 0], sizes = [1, 128], strides = [1, 1]} : vector<19x128xf32> to vector<1x128xf32>
    %5 = vector.extract_strided_slice %0 {offsets = [18, 0], sizes = [1, 128], strides = [1, 1]} : vector<19x128xf32> to vector<1x128xf32>
    %6 = vector.extract_strided_slice %1 {offsets = [0, 0], sizes = [128, 128], strides = [1, 1]} : vector<256x128xbf16> to vector<128x128xbf16>
    %7 = vector.extract_strided_slice %1 {offsets = [128, 0], sizes = [32, 128], strides = [1, 1]} : vector<256x128xbf16> to vector<32x128xbf16>
    %8 = vector.extract_strided_slice %1 {offsets = [160, 0], sizes = [64, 128], strides = [1, 1]} : vector<256x128xbf16> to vector<64x128xbf16>
    %9 = vector.extract_strided_slice %1 {offsets = [224, 0], sizes = [32, 128], strides = [1, 1]} : vector<256x128xbf16> to vector<32x128xbf16>
    %10 = arith.truncf %2 : vector<16x128xf32> to vector<16x128xbf16>
    %cst = arith.constant dense<0.000000e+00> : vector<16x128xf32>
    %11 = tpu.matmul %10, %6, %cst {dimension_numbers = #tpu.dot_dimension_numbers<[1], [0], [0], [1], [0, 0, 1, 1], [], []>} : vector<16x128xbf16>, vector<128x128xbf16>, vector<16x128xf32> -> vector<16x128xf32>
    %12 = vector.broadcast %3 : vector<1x128xf32> to vector<16x128xf32>
    %13 = arith.addf %11, %12 : vector<16x128xf32>
    %cst_3 = arith.constant 0.000000e+00 : bf16
    %14 = vector.broadcast %cst_3 : bf16 to vector<32x128xbf16>
    %15 = tpu.concatenate %7, %14 in 0 : vector<32x128xbf16>, vector<32x128xbf16> -> vector<64x128xbf16>
    %16 = tpu.concatenate %15, %8 in 1 : vector<64x128xbf16>, vector<64x128xbf16> -> vector<64x256xbf16>
    %17 = vector.shape_cast %4 : vector<1x128xf32> to vector<1x128xf32>
    %18 = vector.broadcast %17 : vector<1x128xf32> to vector<16x128xf32>
    %19 = tpu.concatenate %13, %18 in 1 : vector<16x128xf32>, vector<16x128xf32> -> vector<16x256xf32>
    %20 = vector.extract_strided_slice %13 {offsets = [0, 0], sizes = [2, 128], strides = [1, 1]} : vector<16x128xf32> to vector<2x128xf32>
    %21 = arith.negf %20 : vector<2x128xf32>
    %22 = math.exp %21 : vector<2x128xf32>
    %cst_4 = arith.constant 1.000000e+00 : f32
    %23 = vector.broadcast %cst_4 : f32 to vector<2x128xf32>
    %24 = arith.addf %23, %22 : vector<2x128xf32>
    %25 = arith.divf %23, %24 : vector<2x128xf32>
    %26 = math.tanh %20 : vector<2x128xf32>
    %27 = vector.extract_strided_slice %25 {offsets = [0, 0], sizes = [2, 32], strides = [1, 1]} : vector<2x128xf32> to vector<2x32xf32>
    %28 = vector.extract_strided_slice %26 {offsets = [0, 64], sizes = [2, 32], strides = [1, 1]} : vector<2x128xf32> to vector<2x32xf32>
    %29 = arith.mulf %27, %28 : vector<2x32xf32>
    %30 = vector.extract_strided_slice %25 {offsets = [0, 96], sizes = [2, 32], strides = [1, 1]} : vector<2x128xf32> to vector<2x32xf32>
    %31 = math.tanh %29 : vector<2x32xf32>
    %32 = arith.mulf %30, %31 : vector<2x32xf32>
    %cst_5 = arith.constant 0.000000e+00 : f32
    %33 = vector.broadcast %cst_5 : f32 to vector<2x32xf32>
    %cst_6 = arith.constant 0.000000e+00 : f32
    %34 = vector.broadcast %cst_6 : f32 to vector<2x32xf32>
    %35 = tpu.concatenate %32, %33 in 1 : vector<2x32xf32>, vector<2x32xf32> -> vector<2x64xf32>
    %36 = arith.truncf %35 : vector<2x64xf32> to vector<2x64xbf16>
    %cst_7 = arith.constant dense<0.000000e+00> : vector<2x256xf32>
    %37 = tpu.matmul %36, %16, %cst_7 {dimension_numbers = #tpu.dot_dimension_numbers<[1], [0], [0], [1], [0, 0, 1, 1], [], []>} : vector<2x64xbf16>, vector<64x256xbf16>, vector<2x256xf32> -> vector<2x256xf32>
    %38 = vector.extract_strided_slice %19 {offsets = [2, 0], sizes = [2, 256], strides = [1, 1]} : vector<16x256xf32> to vector<2x256xf32>
    %39 = arith.addf %37, %38 : vector<2x256xf32>
    %40 = arith.negf %39 : vector<2x256xf32>
    %41 = math.exp %40 : vector<2x256xf32>
    %cst_8 = arith.constant 1.000000e+00 : f32
    %42 = vector.broadcast %cst_8 : f32 to vector<2x256xf32>
    %43 = arith.addf %42, %41 : vector<2x256xf32>
    %44 = arith.divf %42, %43 : vector<2x256xf32>
    %45 = math.tanh %39 : vector<2x256xf32>
    %46 = vector.extract_strided_slice %44 {offsets = [0, 0], sizes = [2, 32], strides = [1, 1]} : vector<2x256xf32> to vector<2x32xf32>
    %47 = vector.extract_strided_slice %44 {offsets = [0, 32], sizes = [2, 32], strides = [1, 1]} : vector<2x256xf32> to vector<2x32xf32>
    %48 = vector.extract_strided_slice %45 {offsets = [0, 64], sizes = [2, 32], strides = [1, 1]} : vector<2x256xf32> to vector<2x32xf32>
    %49 = vector.extract_strided_slice %44 {offsets = [0, 96], sizes = [2, 32], strides = [1, 1]} : vector<2x256xf32> to vector<2x32xf32>
    %50 = arith.mulf %47, %29 : vector<2x32xf32>
    %51 = arith.mulf %46, %48 : vector<2x32xf32>
    %52 = arith.addf %50, %51 : vector<2x32xf32>
    %53 = vector.extract_strided_slice %44 {offsets = [0, 128], sizes = [2, 32], strides = [1, 1]} : vector<2x256xf32> to vector<2x32xf32>
    %54 = vector.extract_strided_slice %44 {offsets = [0, 160], sizes = [2, 32], strides = [1, 1]} : vector<2x256xf32> to vector<2x32xf32>
    %55 = vector.extract_strided_slice %45 {offsets = [0, 192], sizes = [2, 32], strides = [1, 1]} : vector<2x256xf32> to vector<2x32xf32>
    %56 = vector.extract_strided_slice %44 {offsets = [0, 224], sizes = [2, 32], strides = [1, 1]} : vector<2x256xf32> to vector<2x32xf32>
    %57 = arith.mulf %54, %34 : vector<2x32xf32>
    %58 = arith.mulf %53, %55 : vector<2x32xf32>
    %59 = arith.addf %57, %58 : vector<2x32xf32>
    %60 = tpu.concatenate %52, %59 in 1 : vector<2x32xf32>, vector<2x32xf32> -> vector<2x64xf32>
    %61 = math.tanh %60 : vector<2x64xf32>
    %62 = vector.extract_strided_slice %61 {offsets = [0, 0], sizes = [2, 32], strides = [1, 1]} : vector<2x64xf32> to vector<2x32xf32>
    %63 = arith.mulf %49, %62 : vector<2x32xf32>
    %64 = vector.extract_strided_slice %61 {offsets = [0, 32], sizes = [2, 32], strides = [1, 1]} : vector<2x64xf32> to vector<2x32xf32>
    %65 = arith.mulf %56, %64 : vector<2x32xf32>
    %66 = tpu.concatenate %63, %65 in 1 : vector<2x32xf32>, vector<2x32xf32> -> vector<2x64xf32>
    %67 = arith.truncf %66 : vector<2x64xf32> to vector<2x64xbf16>
    %cst_9 = arith.constant dense<0.000000e+00> : vector<2x256xf32>
    %68 = tpu.matmul %67, %16, %cst_9 {dimension_numbers = #tpu.dot_dimension_numbers<[1], [0], [0], [1], [0, 0, 1, 1], [], []>} : vector<2x64xbf16>, vector<64x256xbf16>, vector<2x256xf32> -> vector<2x256xf32>
    %69 = vector.extract_strided_slice %19 {offsets = [4, 0], sizes = [2, 256], strides = [1, 1]} : vector<16x256xf32> to vector<2x256xf32>
    %70 = arith.addf %68, %69 : vector<2x256xf32>
    %71 = arith.negf %70 : vector<2x256xf32>
    %72 = math.exp %71 : vector<2x256xf32>
    %cst_10 = arith.constant 1.000000e+00 : f32
    %73 = vector.broadcast %cst_10 : f32 to vector<2x256xf32>
    %74 = arith.addf %73, %72 : vector<2x256xf32>
    %75 = arith.divf %73, %74 : vector<2x256xf32>
    %76 = math.tanh %70 : vector<2x256xf32>
    %77 = vector.extract_strided_slice %75 {offsets = [0, 0], sizes = [2, 32], strides = [1, 1]} : vector<2x256xf32> to vector<2x32xf32>
    %78 = vector.extract_strided_slice %75 {offsets = [0, 32], sizes = [2, 32], strides = [1, 1]} : vector<2x256xf32> to vector<2x32xf32>
    %79 = vector.extract_strided_slice %76 {offsets = [0, 64], sizes = [2, 32], strides = [1, 1]} : vector<2x256xf32> to vector<2x32xf32>
    %80 = vector.extract_strided_slice %75 {offsets = [0, 96], sizes = [2, 32], strides = [1, 1]} : vector<2x256xf32> to vector<2x32xf32>
    %81 = arith.mulf %78, %52 : vector<2x32xf32>
    %82 = arith.mulf %77, %79 : vector<2x32xf32>
    %83 = arith.addf %81, %82 : vector<2x32xf32>
    %84 = vector.extract_strided_slice %75 {offsets = [0, 128], sizes = [2, 32], strides = [1, 1]} : vector<2x256xf32> to vector<2x32xf32>
    %85 = vector.extract_strided_slice %75 {offsets = [0, 160], sizes = [2, 32], strides = [1, 1]} : vector<2x256xf32> to vector<2x32xf32>
    %86 = vector.extract_strided_slice %76 {offsets = [0, 192], sizes = [2, 32], strides = [1, 1]} : vector<2x256xf32> to vector<2x32xf32>
    %87 = vector.extract_strided_slice %75 {offsets = [0, 224], sizes = [2, 32], strides = [1, 1]} : vector<2x256xf32> to vector<2x32xf32>
    %88 = arith.mulf %85, %59 : vector<2x32xf32>
    %89 = arith.mulf %84, %86 : vector<2x32xf32>
    %90 = arith.addf %88, %89 : vector<2x32xf32>
    %91 = tpu.concatenate %83, %90 in 1 : vector<2x32xf32>, vector<2x32xf32> -> vector<2x64xf32>
    %92 = math.tanh %91 : vector<2x64xf32>
    %93 = vector.extract_strided_slice %92 {offsets = [0, 0], sizes = [2, 32], strides = [1, 1]} : vector<2x64xf32> to vector<2x32xf32>
    %94 = arith.mulf %80, %93 : vector<2x32xf32>
    %95 = vector.extract_strided_slice %92 {offsets = [0, 32], sizes = [2, 32], strides = [1, 1]} : vector<2x64xf32> to vector<2x32xf32>
    %96 = arith.mulf %87, %95 : vector<2x32xf32>
    %97 = tpu.concatenate %94, %96 in 1 : vector<2x32xf32>, vector<2x32xf32> -> vector<2x64xf32>
    %98 = arith.truncf %97 : vector<2x64xf32> to vector<2x64xbf16>
    %cst_11 = arith.constant dense<0.000000e+00> : vector<2x256xf32>
    %99 = tpu.matmul %98, %16, %cst_11 {dimension_numbers = #tpu.dot_dimension_numbers<[1], [0], [0], [1], [0, 0, 1, 1], [], []>} : vector<2x64xbf16>, vector<64x256xbf16>, vector<2x256xf32> -> vector<2x256xf32>
    %100 = vector.extract_strided_slice %19 {offsets = [6, 0], sizes = [2, 256], strides = [1, 1]} : vector<16x256xf32> to vector<2x256xf32>
    %101 = arith.addf %99, %100 : vector<2x256xf32>
    %102 = arith.negf %101 : vector<2x256xf32>
    %103 = math.exp %102 : vector<2x256xf32>
    %cst_12 = arith.constant 1.000000e+00 : f32
    %104 = vector.broadcast %cst_12 : f32 to vector<2x256xf32>
    %105 = arith.addf %104, %103 : vector<2x256xf32>
    %106 = arith.divf %104, %105 : vector<2x256xf32>
    %107 = math.tanh %101 : vector<2x256xf32>
    %108 = vector.extract_strided_slice %106 {offsets = [0, 0], sizes = [2, 32], strides = [1, 1]} : vector<2x256xf32> to vector<2x32xf32>
    %109 = vector.extract_strided_slice %106 {offsets = [0, 32], sizes = [2, 32], strides = [1, 1]} : vector<2x256xf32> to vector<2x32xf32>
    %110 = vector.extract_strided_slice %107 {offsets = [0, 64], sizes = [2, 32], strides = [1, 1]} : vector<2x256xf32> to vector<2x32xf32>
    %111 = vector.extract_strided_slice %106 {offsets = [0, 96], sizes = [2, 32], strides = [1, 1]} : vector<2x256xf32> to vector<2x32xf32>
    %112 = arith.mulf %109, %83 : vector<2x32xf32>
    %113 = arith.mulf %108, %110 : vector<2x32xf32>
    %114 = arith.addf %112, %113 : vector<2x32xf32>
    %115 = vector.extract_strided_slice %106 {offsets = [0, 128], sizes = [2, 32], strides = [1, 1]} : vector<2x256xf32> to vector<2x32xf32>
    %116 = vector.extract_strided_slice %106 {offsets = [0, 160], sizes = [2, 32], strides = [1, 1]} : vector<2x256xf32> to vector<2x32xf32>
    %117 = vector.extract_strided_slice %107 {offsets = [0, 192], sizes = [2, 32], strides = [1, 1]} : vector<2x256xf32> to vector<2x32xf32>
    %118 = vector.extract_strided_slice %106 {offsets = [0, 224], sizes = [2, 32], strides = [1, 1]} : vector<2x256xf32> to vector<2x32xf32>
    %119 = arith.mulf %116, %90 : vector<2x32xf32>
    %120 = arith.mulf %115, %117 : vector<2x32xf32>
    %121 = arith.addf %119, %120 : vector<2x32xf32>
    %122 = tpu.concatenate %114, %121 in 1 : vector<2x32xf32>, vector<2x32xf32> -> vector<2x64xf32>
    %123 = math.tanh %122 : vector<2x64xf32>
    %124 = vector.extract_strided_slice %123 {offsets = [0, 0], sizes = [2, 32], strides = [1, 1]} : vector<2x64xf32> to vector<2x32xf32>
    %125 = arith.mulf %111, %124 : vector<2x32xf32>
    %126 = vector.extract_strided_slice %123 {offsets = [0, 32], sizes = [2, 32], strides = [1, 1]} : vector<2x64xf32> to vector<2x32xf32>
    %127 = arith.mulf %118, %126 : vector<2x32xf32>
    %128 = tpu.concatenate %125, %127 in 1 : vector<2x32xf32>, vector<2x32xf32> -> vector<2x64xf32>
    %129 = arith.truncf %128 : vector<2x64xf32> to vector<2x64xbf16>
    %cst_13 = arith.constant dense<0.000000e+00> : vector<2x256xf32>
    %130 = tpu.matmul %129, %16, %cst_13 {dimension_numbers = #tpu.dot_dimension_numbers<[1], [0], [0], [1], [0, 0, 1, 1], [], []>} : vector<2x64xbf16>, vector<64x256xbf16>, vector<2x256xf32> -> vector<2x256xf32>
    %131 = vector.extract_strided_slice %19 {offsets = [8, 0], sizes = [2, 256], strides = [1, 1]} : vector<16x256xf32> to vector<2x256xf32>
    %132 = arith.addf %130, %131 : vector<2x256xf32>
    %133 = arith.negf %132 : vector<2x256xf32>
    %134 = math.exp %133 : vector<2x256xf32>
    %cst_14 = arith.constant 1.000000e+00 : f32
    %135 = vector.broadcast %cst_14 : f32 to vector<2x256xf32>
    %136 = arith.addf %135, %134 : vector<2x256xf32>
    %137 = arith.divf %135, %136 : vector<2x256xf32>
    %138 = math.tanh %132 : vector<2x256xf32>
    %139 = vector.extract_strided_slice %137 {offsets = [0, 0], sizes = [2, 32], strides = [1, 1]} : vector<2x256xf32> to vector<2x32xf32>
    %140 = vector.extract_strided_slice %137 {offsets = [0, 32], sizes = [2, 32], strides = [1, 1]} : vector<2x256xf32> to vector<2x32xf32>
    %141 = vector.extract_strided_slice %138 {offsets = [0, 64], sizes = [2, 32], strides = [1, 1]} : vector<2x256xf32> to vector<2x32xf32>
    %142 = vector.extract_strided_slice %137 {offsets = [0, 96], sizes = [2, 32], strides = [1, 1]} : vector<2x256xf32> to vector<2x32xf32>
    %143 = arith.mulf %140, %114 : vector<2x32xf32>
    %144 = arith.mulf %139, %141 : vector<2x32xf32>
    %145 = arith.addf %143, %144 : vector<2x32xf32>
    %146 = vector.extract_strided_slice %137 {offsets = [0, 128], sizes = [2, 32], strides = [1, 1]} : vector<2x256xf32> to vector<2x32xf32>
    %147 = vector.extract_strided_slice %137 {offsets = [0, 160], sizes = [2, 32], strides = [1, 1]} : vector<2x256xf32> to vector<2x32xf32>
    %148 = vector.extract_strided_slice %138 {offsets = [0, 192], sizes = [2, 32], strides = [1, 1]} : vector<2x256xf32> to vector<2x32xf32>
    %149 = vector.extract_strided_slice %137 {offsets = [0, 224], sizes = [2, 32], strides = [1, 1]} : vector<2x256xf32> to vector<2x32xf32>
    %150 = arith.mulf %147, %121 : vector<2x32xf32>
    %151 = arith.mulf %146, %148 : vector<2x32xf32>
    %152 = arith.addf %150, %151 : vector<2x32xf32>
    %153 = tpu.concatenate %145, %152 in 1 : vector<2x32xf32>, vector<2x32xf32> -> vector<2x64xf32>
    %154 = math.tanh %153 : vector<2x64xf32>
    %155 = vector.extract_strided_slice %154 {offsets = [0, 0], sizes = [2, 32], strides = [1, 1]} : vector<2x64xf32> to vector<2x32xf32>
    %156 = arith.mulf %142, %155 : vector<2x32xf32>
    %157 = vector.extract_strided_slice %154 {offsets = [0, 32], sizes = [2, 32], strides = [1, 1]} : vector<2x64xf32> to vector<2x32xf32>
    %158 = arith.mulf %149, %157 : vector<2x32xf32>
    %159 = tpu.concatenate %156, %158 in 1 : vector<2x32xf32>, vector<2x32xf32> -> vector<2x64xf32>
    %160 = arith.truncf %159 : vector<2x64xf32> to vector<2x64xbf16>
    %cst_15 = arith.constant dense<0.000000e+00> : vector<2x256xf32>
    %161 = tpu.matmul %160, %16, %cst_15 {dimension_numbers = #tpu.dot_dimension_numbers<[1], [0], [0], [1], [0, 0, 1, 1], [], []>} : vector<2x64xbf16>, vector<64x256xbf16>, vector<2x256xf32> -> vector<2x256xf32>
    %162 = vector.extract_strided_slice %19 {offsets = [10, 0], sizes = [2, 256], strides = [1, 1]} : vector<16x256xf32> to vector<2x256xf32>
    %163 = arith.addf %161, %162 : vector<2x256xf32>
    %164 = arith.negf %163 : vector<2x256xf32>
    %165 = math.exp %164 : vector<2x256xf32>
    %cst_16 = arith.constant 1.000000e+00 : f32
    %166 = vector.broadcast %cst_16 : f32 to vector<2x256xf32>
    %167 = arith.addf %166, %165 : vector<2x256xf32>
    %168 = arith.divf %166, %167 : vector<2x256xf32>
    %169 = math.tanh %163 : vector<2x256xf32>
    %170 = vector.extract_strided_slice %168 {offsets = [0, 0], sizes = [2, 32], strides = [1, 1]} : vector<2x256xf32> to vector<2x32xf32>
    %171 = vector.extract_strided_slice %168 {offsets = [0, 32], sizes = [2, 32], strides = [1, 1]} : vector<2x256xf32> to vector<2x32xf32>
    %172 = vector.extract_strided_slice %169 {offsets = [0, 64], sizes = [2, 32], strides = [1, 1]} : vector<2x256xf32> to vector<2x32xf32>
    %173 = vector.extract_strided_slice %168 {offsets = [0, 96], sizes = [2, 32], strides = [1, 1]} : vector<2x256xf32> to vector<2x32xf32>
    %174 = arith.mulf %171, %145 : vector<2x32xf32>
    %175 = arith.mulf %170, %172 : vector<2x32xf32>
    %176 = arith.addf %174, %175 : vector<2x32xf32>
    %177 = vector.extract_strided_slice %168 {offsets = [0, 128], sizes = [2, 32], strides = [1, 1]} : vector<2x256xf32> to vector<2x32xf32>
    %178 = vector.extract_strided_slice %168 {offsets = [0, 160], sizes = [2, 32], strides = [1, 1]} : vector<2x256xf32> to vector<2x32xf32>
    %179 = vector.extract_strided_slice %169 {offsets = [0, 192], sizes = [2, 32], strides = [1, 1]} : vector<2x256xf32> to vector<2x32xf32>
    %180 = vector.extract_strided_slice %168 {offsets = [0, 224], sizes = [2, 32], strides = [1, 1]} : vector<2x256xf32> to vector<2x32xf32>
    %181 = arith.mulf %178, %152 : vector<2x32xf32>
    %182 = arith.mulf %177, %179 : vector<2x32xf32>
    %183 = arith.addf %181, %182 : vector<2x32xf32>
    %184 = tpu.concatenate %176, %183 in 1 : vector<2x32xf32>, vector<2x32xf32> -> vector<2x64xf32>
    %185 = math.tanh %184 : vector<2x64xf32>
    %186 = vector.extract_strided_slice %185 {offsets = [0, 0], sizes = [2, 32], strides = [1, 1]} : vector<2x64xf32> to vector<2x32xf32>
    %187 = arith.mulf %173, %186 : vector<2x32xf32>
    %188 = vector.extract_strided_slice %185 {offsets = [0, 32], sizes = [2, 32], strides = [1, 1]} : vector<2x64xf32> to vector<2x32xf32>
    %189 = arith.mulf %180, %188 : vector<2x32xf32>
    %190 = tpu.concatenate %187, %189 in 1 : vector<2x32xf32>, vector<2x32xf32> -> vector<2x64xf32>
    %191 = arith.truncf %190 : vector<2x64xf32> to vector<2x64xbf16>
    %cst_17 = arith.constant dense<0.000000e+00> : vector<2x256xf32>
    %192 = tpu.matmul %191, %16, %cst_17 {dimension_numbers = #tpu.dot_dimension_numbers<[1], [0], [0], [1], [0, 0, 1, 1], [], []>} : vector<2x64xbf16>, vector<64x256xbf16>, vector<2x256xf32> -> vector<2x256xf32>
    %193 = vector.extract_strided_slice %19 {offsets = [12, 0], sizes = [2, 256], strides = [1, 1]} : vector<16x256xf32> to vector<2x256xf32>
    %194 = arith.addf %192, %193 : vector<2x256xf32>
    %195 = arith.negf %194 : vector<2x256xf32>
    %196 = math.exp %195 : vector<2x256xf32>
    %cst_18 = arith.constant 1.000000e+00 : f32
    %197 = vector.broadcast %cst_18 : f32 to vector<2x256xf32>
    %198 = arith.addf %197, %196 : vector<2x256xf32>
    %199 = arith.divf %197, %198 : vector<2x256xf32>
    %200 = math.tanh %194 : vector<2x256xf32>
    %201 = vector.extract_strided_slice %199 {offsets = [0, 0], sizes = [2, 32], strides = [1, 1]} : vector<2x256xf32> to vector<2x32xf32>
    %202 = vector.extract_strided_slice %199 {offsets = [0, 32], sizes = [2, 32], strides = [1, 1]} : vector<2x256xf32> to vector<2x32xf32>
    %203 = vector.extract_strided_slice %200 {offsets = [0, 64], sizes = [2, 32], strides = [1, 1]} : vector<2x256xf32> to vector<2x32xf32>
    %204 = vector.extract_strided_slice %199 {offsets = [0, 96], sizes = [2, 32], strides = [1, 1]} : vector<2x256xf32> to vector<2x32xf32>
    %205 = arith.mulf %202, %176 : vector<2x32xf32>
    %206 = arith.mulf %201, %203 : vector<2x32xf32>
    %207 = arith.addf %205, %206 : vector<2x32xf32>
    %208 = vector.extract_strided_slice %199 {offsets = [0, 128], sizes = [2, 32], strides = [1, 1]} : vector<2x256xf32> to vector<2x32xf32>
    %209 = vector.extract_strided_slice %199 {offsets = [0, 160], sizes = [2, 32], strides = [1, 1]} : vector<2x256xf32> to vector<2x32xf32>
    %210 = vector.extract_strided_slice %200 {offsets = [0, 192], sizes = [2, 32], strides = [1, 1]} : vector<2x256xf32> to vector<2x32xf32>
    %211 = vector.extract_strided_slice %199 {offsets = [0, 224], sizes = [2, 32], strides = [1, 1]} : vector<2x256xf32> to vector<2x32xf32>
    %212 = arith.mulf %209, %183 : vector<2x32xf32>
    %213 = arith.mulf %208, %210 : vector<2x32xf32>
    %214 = arith.addf %212, %213 : vector<2x32xf32>
    %215 = tpu.concatenate %207, %214 in 1 : vector<2x32xf32>, vector<2x32xf32> -> vector<2x64xf32>
    %216 = math.tanh %215 : vector<2x64xf32>
    %217 = vector.extract_strided_slice %216 {offsets = [0, 0], sizes = [2, 32], strides = [1, 1]} : vector<2x64xf32> to vector<2x32xf32>
    %218 = arith.mulf %204, %217 : vector<2x32xf32>
    %219 = vector.extract_strided_slice %216 {offsets = [0, 32], sizes = [2, 32], strides = [1, 1]} : vector<2x64xf32> to vector<2x32xf32>
    %220 = arith.mulf %211, %219 : vector<2x32xf32>
    %221 = tpu.concatenate %218, %220 in 1 : vector<2x32xf32>, vector<2x32xf32> -> vector<2x64xf32>
    %222 = arith.truncf %221 : vector<2x64xf32> to vector<2x64xbf16>
    %cst_19 = arith.constant dense<0.000000e+00> : vector<2x256xf32>
    %223 = tpu.matmul %222, %16, %cst_19 {dimension_numbers = #tpu.dot_dimension_numbers<[1], [0], [0], [1], [0, 0, 1, 1], [], []>} : vector<2x64xbf16>, vector<64x256xbf16>, vector<2x256xf32> -> vector<2x256xf32>
    %224 = vector.extract_strided_slice %19 {offsets = [14, 0], sizes = [2, 256], strides = [1, 1]} : vector<16x256xf32> to vector<2x256xf32>
    %225 = arith.addf %223, %224 : vector<2x256xf32>
    %226 = arith.negf %225 : vector<2x256xf32>
    %227 = math.exp %226 : vector<2x256xf32>
    %cst_20 = arith.constant 1.000000e+00 : f32
    %228 = vector.broadcast %cst_20 : f32 to vector<2x256xf32>
    %229 = arith.addf %228, %227 : vector<2x256xf32>
    %230 = arith.divf %228, %229 : vector<2x256xf32>
    %231 = math.tanh %225 : vector<2x256xf32>
    %232 = vector.extract_strided_slice %230 {offsets = [0, 0], sizes = [2, 32], strides = [1, 1]} : vector<2x256xf32> to vector<2x32xf32>
    %233 = vector.extract_strided_slice %230 {offsets = [0, 32], sizes = [2, 32], strides = [1, 1]} : vector<2x256xf32> to vector<2x32xf32>
    %234 = vector.extract_strided_slice %231 {offsets = [0, 64], sizes = [2, 32], strides = [1, 1]} : vector<2x256xf32> to vector<2x32xf32>
    %235 = vector.extract_strided_slice %230 {offsets = [0, 96], sizes = [2, 32], strides = [1, 1]} : vector<2x256xf32> to vector<2x32xf32>
    %236 = arith.mulf %233, %207 : vector<2x32xf32>
    %237 = arith.mulf %232, %234 : vector<2x32xf32>
    %238 = arith.addf %236, %237 : vector<2x32xf32>
    %239 = vector.extract_strided_slice %230 {offsets = [0, 128], sizes = [2, 32], strides = [1, 1]} : vector<2x256xf32> to vector<2x32xf32>
    %240 = vector.extract_strided_slice %230 {offsets = [0, 160], sizes = [2, 32], strides = [1, 1]} : vector<2x256xf32> to vector<2x32xf32>
    %241 = vector.extract_strided_slice %231 {offsets = [0, 192], sizes = [2, 32], strides = [1, 1]} : vector<2x256xf32> to vector<2x32xf32>
    %242 = vector.extract_strided_slice %230 {offsets = [0, 224], sizes = [2, 32], strides = [1, 1]} : vector<2x256xf32> to vector<2x32xf32>
    %243 = arith.mulf %240, %214 : vector<2x32xf32>
    %244 = arith.mulf %239, %241 : vector<2x32xf32>
    %245 = arith.addf %243, %244 : vector<2x32xf32>
    %246 = tpu.concatenate %238, %245 in 1 : vector<2x32xf32>, vector<2x32xf32> -> vector<2x64xf32>
    %247 = math.tanh %246 : vector<2x64xf32>
    %248 = vector.extract_strided_slice %247 {offsets = [0, 0], sizes = [2, 32], strides = [1, 1]} : vector<2x64xf32> to vector<2x32xf32>
    %249 = arith.mulf %235, %248 : vector<2x32xf32>
    %250 = vector.extract_strided_slice %247 {offsets = [0, 32], sizes = [2, 32], strides = [1, 1]} : vector<2x64xf32> to vector<2x32xf32>
    %251 = arith.mulf %242, %250 : vector<2x32xf32>
    %252 = tpu.concatenate %249, %251 in 1 : vector<2x32xf32>, vector<2x32xf32> -> vector<2x64xf32>
    %253 = arith.truncf %252 : vector<2x64xf32> to vector<2x64xbf16>
    %cst_21 = arith.constant dense<0.000000e+00> : vector<2x128xf32>
    %254 = tpu.matmul %253, %8, %cst_21 {dimension_numbers = #tpu.dot_dimension_numbers<[1], [0], [0], [1], [0, 0, 1, 1], [], []>} : vector<2x64xbf16>, vector<64x128xbf16>, vector<2x128xf32> -> vector<2x128xf32>
    %255 = vector.broadcast %4 : vector<1x128xf32> to vector<2x128xf32>
    %256 = arith.addf %254, %255 : vector<2x128xf32>
    %257 = arith.negf %256 : vector<2x128xf32>
    %258 = math.exp %257 : vector<2x128xf32>
    %cst_22 = arith.constant 1.000000e+00 : f32
    %259 = vector.broadcast %cst_22 : f32 to vector<2x128xf32>
    %260 = arith.addf %259, %258 : vector<2x128xf32>
    %261 = arith.divf %259, %260 : vector<2x128xf32>
    %262 = math.tanh %256 : vector<2x128xf32>
    %263 = vector.extract_strided_slice %261 {offsets = [0, 0], sizes = [2, 32], strides = [1, 1]} : vector<2x128xf32> to vector<2x32xf32>
    %264 = vector.extract_strided_slice %261 {offsets = [0, 32], sizes = [2, 32], strides = [1, 1]} : vector<2x128xf32> to vector<2x32xf32>
    %265 = vector.extract_strided_slice %262 {offsets = [0, 64], sizes = [2, 32], strides = [1, 1]} : vector<2x128xf32> to vector<2x32xf32>
    %266 = vector.extract_strided_slice %261 {offsets = [0, 96], sizes = [2, 32], strides = [1, 1]} : vector<2x128xf32> to vector<2x32xf32>
    %267 = arith.mulf %264, %245 : vector<2x32xf32>
    %268 = arith.mulf %263, %265 : vector<2x32xf32>
    %269 = arith.addf %267, %268 : vector<2x32xf32>
    %270 = math.tanh %269 : vector<2x32xf32>
    %271 = arith.mulf %266, %270 : vector<2x32xf32>
    %272 = arith.truncf %271 : vector<2x32xf32> to vector<2x32xbf16>
    %cst_23 = arith.constant dense<0.000000e+00> : vector<2x128xf32>
    %273 = tpu.matmul %272, %9, %cst_23 {dimension_numbers = #tpu.dot_dimension_numbers<[1], [0], [0], [1], [0, 0, 1, 1], [], []>} : vector<2x32xbf16>, vector<32x128xbf16>, vector<2x128xf32> -> vector<2x128xf32>
    %274 = vector.broadcast %5 : vector<1x128xf32> to vector<2x128xf32>
    %275 = arith.addf %273, %274 : vector<2x128xf32>
    %c0_24 = arith.constant 0 : index
    %c0_25 = arith.constant 0 : index
    %276 = vector.load %arg2[%c0_24, %c0_25] : memref<2x128xf32, #tpu.memory_space<vmem>>, vector<2x128xf32>
    tpu.vector_store %arg2[%c0_24, %c0_25], %275 {strides = array<i32>} : memref<2x128xf32, #tpu.memory_space<vmem>>, vector<2x128xf32>,
    return
  }
}

</mosaic_0001>

<bundles_post_ra>
// kernel: disaster_lstm_forward.1
= control target key start
LH: loop header
LB: loop body
LE: loop exit
PB: predicated region body
PF: predicated region fallthrough
CT: control target
= control target key end

     0   :  { %v1371_v1 = vmov 0.0   ;;  %vm1372_vm0 = vmmov 0   ;;  %s1711_s0 = inlined_call_operand.vmem [shape: f32[19,128], index: 0, kind: input, shape index: {}]   ;;  %s1712_s1 = inlined_call_operand.vmem [shape: bf16[256,128], index: 1, kind: input, shape index: {}]   ;;  %s1713_s2 = inlined_call_operand.hbm [shape: f32[2,128], index: 2, kind: output, shape index: {}]  }
   0x1   :  { %v1218_v0 = vld [vmem:[%s1712_s1 + $0x38] sm:$0xff]   ;;  %1171 = vmatprep.subr.bf16.mxu0 %v1371_v1  ;;  %v1219_v2 = vld [vmem:[%s1712_s1 + $0x30] sm:$0xff]   ;;  %1187 = vmatprep.mubr.msk.bf16.mxu0 %vm1372_vm0, %v1371_v1  ;;  %v1220_v3 = vld [vmem:[%s1712_s1 + $0x28] sm:$0xff]  }
   0x2   :  { %1172 = vmatpush3.bf16.msra.mxu0 %v1218_v0  ;;  %v1221_v4 = vld [vmem:[%s1712_s1 + $0x20] sm:$0xff]   ;;  %v1222_v5 = vld [vmem:[%s1712_s1 + $0x18] sm:$0xff]  }
   0x3   :  { %1173 = vmatprep.subr.bf16.mxu0 %v1371_v1 }
   0x6   :  { %1174 = vmatpush3.bf16.msra.mxu0 %v1219_v2 }
   0x7   :  { %1175 = vmatprep.subr.bf16.mxu0 %v1371_v1 }
   0xa   :  { %1176 = vmatpush3.bf16.msra.mxu0 %v1220_v3 }
   0xb   :  { %1177 = vmatprep.subr.bf16.mxu0 %v1371_v1 }
   0xe   :  { %1178 = vmatpush3.bf16.msra.mxu0 %v1221_v4 }
   0xf   :  { %7 = vsyncpa [#allocation3], 0  ;;  %1179 = vmatprep.subr.bf16.mxu0 %v1371_v1  ;;  %v1223_v6 = vld [vmem:[%s1712_s1 + $0x10] sm:$0xff]   ;;  %v1224_v7 = vld [vmem:[%s1712_s1 + $0x8] sm:$0xff]   ;;  %v49_v12 = vlaneseq  ;;  %s1373_s3 = smov 64   ;;  %v1374_v32 = vmov 0  }
  0x10   :  { %v1225_v8 = vld [vmem:[%s1712_s1] sm:$0xff]   ;;  %v14_v10 = vld [vmem:[%s1711_s0 + $0x8] sm:$0xff]  ;;  %v1439_v15 = vld [vmem:[%s1711_s0 + $0x10] sm:$0x7]  ;;  %249 = vmatprep.mubr.bf16.mxu1 %v1374_v32  ;;  %s1375_s14 = smov 96   ;;  %s1376_s15 = smov 32  }
  0x11   :  { %v13_v9 = vld [vmem:[%s1711_s0] sm:$0xff]  ;;  %v1433_v13 = vshrl.u32 %v49_v12, 7  ;;  %v1452_v30 = vld [vmem:[%s1712_s1 + $0x68] sm:$0xff]   ;;  %v1469_v33 = vld [vmem:[%s1712_s1 + $0x58] sm:$0xff]   ;;  %vm205_vm1 = vcmask 261120   ;;  %vm213_vm2 = vcmask 523264  }
  0x12   :  { %1180 = vmatpush3.bf16.msra.mxu0 %v1222_v5  ;;  %v48_v11 = vpack.c.bf16 %v14_v10, %v13_v9  ;;  %v1457_v31 = vld [vmem:[%s1712_s1 + $0x60] sm:$0xff]   ;;  %225 = vmatprep.subr.bf16.mxu1 %v1452_v30  ;;  %v1476_v34 = vld [vmem:[%s1712_s1 + $0x48] sm:$0xff]   ;;  %v1483_v35 = vld [vmem:[%s1712_s1 + $0x50] sm:$0xff]  }
  0x13   :  { %1181 = vmatprep.subr.bf16.mxu0 %v1371_v1  ;;  %v51_v14 = vsub.s32 0, %v1433_v13  ;;  %226 = vmatpush1.bf16.msra.mxu1 %v1374_v32  ;;  %v1495_v37 = vld [vmem:[%s1712_s1 + $0x40] sm:$0xff]   ;;  %v180_v43 = vsub.s32 1, %v1433_v13 }
  0x14   :  { %227 = vmatprep.subr.bf16.mxu1 %v1457_v31 }
  0x15   :  { %v52_v16 = vrot.slane %v1439_v15, %v51_v14  ;;  %v1515_v44 = vrot.slane %v1439_v15, %v180_v43 }
  0x16   :  { %1182 = vmatpush3.bf16.msra.mxu0 %v1223_v6 }
  0x17   :  { %1183 = vmatprep.subr.bf16.mxu0 %v1371_v1  ;;  %228 = vmatpush1.bf16.msra.mxu1 %v1374_v32  ;;  %v210_v46 = vrot.slane %v1515_v44, 2 }
  0x18   :  { %229 = vmatprep.subr.bf16.mxu1 %v1469_v33 }
  0x1a   :  { %1184 = vmatpush3.bf16.msra.mxu0 %v1224_v7 }
  0x1b   :  { %1185 = vmatprep.subr.bf16.mxu0 %v1371_v1  ;;  %230 = vmatpush1.bf16.msra.mxu1 %v1476_v34 }
  0x1c   :  { %231 = vmatprep.subr.bf16.mxu1 %v1483_v35 }
  0x1e   :  { %1186 = vmatpush3.bf16.msra.mxu0 %v1225_v8 }
  0x1f   :  { %447 = vmatprep.subr.bf16.mxu0 %v1452_v30  ;;  %232 = vmatpush1.bf16.msra.mxu1 %v1495_v37 }
  0x20   :  { %338 = vmatprep.subr.bf16.mxu1 %v1452_v30 }
  0x21   :  { %1188 = vmatmul.mubr.bf16.vlgmr.msra.gmra.mxu0 %v48_v11 }
  0x22   :  { %471 = vmatprep.mubr.bf16.mxu0 %v1374_v32  ;;  %448 = vmatpush1.bf16.msra.mxu0 %v1374_v32 }
  0x23   :  { %449 = vmatprep.subr.bf16.mxu0 %v1457_v31 }
  0x26   :  { %450 = vmatpush1.bf16.msra.mxu0 %v1374_v32 }
  0x27   :  { %451 = vmatprep.subr.bf16.mxu0 %v1469_v33 }
  0x2a   :  { %452 = vmatpush1.bf16.msra.mxu0 %v1476_v34 }
  0x2b   :  { %453 = vmatprep.subr.bf16.mxu0 %v1483_v35 }
  0x2e   :  { %454 = vmatpush1.bf16.msra.mxu0 %v1495_v37 }
  0x2f   :  { %660 = vmatprep.subr.bf16.mxu0 %v1452_v30 }
  0xe1   :  { %v135_v17 = vpop.f32.mrf.mxu0 }
  0xe2   :  { %v1442_v18 = vadd.f32 %v135_v17, %v52_v16 }
  0xe3   :  { %v1189_v19 = vpop.f32.mrf.mxu0 }
  0xe4   :  { %1234 = vtanh.f32 %v1442_v18  ;;  %v1127_v24 = vmul.f32 -1.442695, %v1442_v18  ;;  %v209_v45 = vrot.slane %v1442_v18, 2 }
  0xe5   :  { %v138_v20 = vpop.f32.mrf.mxu0 }
  0xe6   :  { %v1445_v21 = vadd.f32 %v138_v20, %v52_v16  ;;  %1236 = vpow2.f32 %v1127_v24 }
  0xe7   :  { %v1190_v22 = vpop.f32.mrf.mxu0 }
  0xf1   :  { %v1235_v23 = vpop.eup %1234 }
  0xf2   :  { %191 = vrot.lane.b32.xlu0 %v1235_v23, %s1373_s3 }
  0xf3   :  { %v1237_v25 = vpop.eup %1236 }
  0xf4   :  { %v186_v26 = vadd.f32 1.0, %v1237_v25  ;;  %v323_v25 = vrot.slane %v1442_v18, 4 }
  0xf6   :  { %1238 = vrcp.f32 %v186_v26  ;;  %v324_v26 = vrot.slane %v1515_v44, 4 }
 0x103   :  { %v1239_v27 = vpop.eup %1238 }
 0x164   :  { %v192_v28 = vpop.permute.xlu0 %191 }
 0x165   :  { %v194_v29 = vmul.f32 %v1239_v27, %v192_v28 }
 0x167   :  { %1240 = vtanh.f32 %v194_v29 }
 0x174   :  { %v1241_v36 = vpop.eup %1240 }
 0x175   :  { %197 = vrot.lane.b32.xlu0 %v1241_v36, %s1375_s14 }
 0x179   :  { %273 = vrot.lane.b32.xlu0 %v194_v29, %s1376_s15 }
 0x1e7   :  { %v198_v38 = vpop.permute.xlu0 %197 }
 0x1e8   :  { %v200_v39 = vmul.f32 %v1239_v27, %v198_v38 }
 0x1ea   :  { %202 = vrot.lane.b32.xlu1 %v200_v39, %s1376_s15 }
 0x1eb   :  { %v274_v4 = vpop.permute.xlu0 %273 }
 0x25c   :  { %v203_v40 = vpop.permute.xlu1 %202 }
 0x25d   :  { %v206_v41 = vsel %vm205_vm1, %v203_v40, 0.0 }
 0x25e   :  { %v207_v42 = vpack.c.bf16 %v206_v41, %v206_v41 }
 0x260   :  { %1128 = vmatmul.mubr.msk.bf16.vlgmr.msra.gmra.mxu1 %vm213_vm2, %v207_v42 }
 0x261   :  { %339 = vmatpush1.bf16.msra.mxu1 %v1374_v32  ;;  %362 = vmatprep.mubr.bf16.mxu1 %v1374_v32 }
 0x262   :  { %340 = vmatprep.subr.bf16.mxu1 %v1457_v31 }
 0x265   :  { %341 = vmatpush1.bf16.msra.mxu1 %v1374_v32 }
 0x266   :  { %342 = vmatprep.subr.bf16.mxu1 %v1469_v33 }
 0x269   :  { %343 = vmatpush1.bf16.msra.mxu1 %v1476_v34 }
 0x26a   :  { %344 = vmatprep.subr.bf16.mxu1 %v1483_v35 }
 0x26d   :  { %345 = vmatpush1.bf16.msra.mxu1 %v1495_v37 }
 0x26e   :  { %552 = vmatprep.subr.bf16.mxu1 %v1452_v30 }
 0x320   :  { %v251_v47 = vpop.f32.mrf.mxu1 }
 0x321   :  { %v252_v48 = vadd.f32 %v251_v47, %v209_v45 }
 0x322   :  { %v253_v49 = vpop.f32.mrf.mxu1 }
 0x323   :  { %1242 = vtanh.f32 %v252_v48  ;;  %v254_v50 = vadd.f32 %v253_v49, %v210_v46  ;;  %v1129_v55 = vmul.f32 -1.442695, %v252_v48 }
 0x324   :  { %v255_v51 = vpop.f32.mrf.mxu1 }
 0x325   :  { %1244 = vtanh.f32 %v254_v50  ;;  %v1130_v56 = vmul.f32 -1.442695, %v254_v50 }
 0x326   :  { %v256_v52 = vpop.f32.mrf.mxu1  ;;  %1246 = vpow2.f32 %v1129_v55 }
 0x327   :  { %1248 = vpow2.f32 %v1130_v56 }
 0x330   :  { %v1243_v53 = vpop.eup %1242 }
 0x331   :  { %278 = vrot.lane.b32.xlu1 %v1243_v53, %s1373_s3 }
 0x332   :  { %v1245_v54 = vpop.eup %1244 }
 0x333   :  { %v1247_v57 = vpop.eup %1246 }
 0x334   :  { %v264_v58 = vadd.f32 1.0, %v1247_v57  ;;  %v1249_v59 = vpop.eup %1248 }
 0x335   :  { %289 = vrot.lane.b32.xlu1 %v1245_v54, %s1373_s3  ;;  %v265_v60 = vadd.f32 1.0, %v1249_v59 }
 0x336   :  { %1250 = vrcp.f32 %v264_v58 }
 0x337   :  { %1252 = vrcp.f32 %v265_v60 }
 0x343   :  { %v1251_v61 = vpop.eup %1250 }
 0x344   :  { %v1253_v0 = vpop.eup %1252  ;;  %v276_v5 = vmul.f32 %v1251_v61, %v274_v4 }
 0x345   :  { %v287_v9 = vmul.f32 0.0, %v1253_v0 }
 0x3a3   :  { %v279_v62 = vpop.permute.xlu1 %278 }
 0x3a4   :  { %v281_v63 = vmul.f32 %v1251_v61, %v279_v62 }
 0x3a6   :  { %283 = vrot.lane.b32.xlu0 %v281_v63, %s1376_s15 }
 0x3a7   :  { %v290_v2 = vpop.permute.xlu1 %289 }
 0x3a8   :  { %v292_v3 = vmul.f32 %v1253_v0, %v290_v2 }
 0x3aa   :  { %294 = vrot.lane.b32.xlu1 %v292_v3, %s1376_s15 }
 0x418   :  { %v284_v6 = vpop.permute.xlu0 %283 }
 0x419   :  { %v1525_v7 = vadd.f32 %v284_v6, %v276_v5 }
 0x41b   :  { %299 = vrot.lane.b32.xlu0 %v1525_v7, %s1375_s14 }
 0x41c   :  { %v295_v8 = vpop.permute.xlu1 %294 }
 0x41d   :  { %v1529_v10 = vadd.f32 %v295_v8, %v287_v9 }
 0x48d   :  { %v300_v11 = vpop.permute.xlu0 %299 }
 0x48e   :  { %v302_v12 = vsel %vm205_vm1, %v300_v11, %v1529_v10  ;;  %v433_v11 = vrot.slane %v1515_v44, 6 }
 0x48f   :  { %1254 = vtanh.f32 %v302_v12 }
 0x49c   :  { %v1255_v14 = vpop.eup %1254 }
 0x49d   :  { %309 = vrot.lane.b32.xlu0 %v1255_v14, %s1373_s3  ;;  %305 = vrot.lane.b32.xlu1 %v1255_v14, %s1375_s14 }
 0x50f   :  { %v310_v15 = vpop.permute.xlu0 %309  ;;  %v306_v16 = vpop.permute.xlu1 %305 }
 0x510   :  { %v312_v17 = vmul.f32 %v1253_v0, %v310_v15  ;;  %v308_v19 = vmul.f32 %v1251_v61, %v306_v16 }
 0x512   :  { %318 = vrot.lane.b32.xlu0 %v312_v17, %s1373_s3  ;;  %314 = vrot.lane.b32.xlu1 %v308_v19, %s1376_s15 }
 0x584   :  { %v319_v20 = vpop.permute.xlu0 %318  ;;  %v315_v22 = vpop.permute.xlu1 %314 }
 0x585   :  { %v321_v23 = vsel %vm205_vm1, %v315_v22, %v319_v20 }
 0x586   :  { %v322_v24 = vpack.c.bf16 %v321_v23, %v321_v23 }
 0x588   :  { %1131 = vmatmul.mubr.msk.bf16.vlgmr.msra.gmra.mxu1 %vm213_vm2, %v322_v24 }
 0x589   :  { %553 = vmatpush1.bf16.msra.mxu1 %v1374_v32  ;;  %576 = vmatprep.mubr.bf16.mxu1 %v1374_v32 }
 0x58a   :  { %554 = vmatprep.subr.bf16.mxu1 %v1457_v31 }
 0x58d   :  { %555 = vmatpush1.bf16.msra.mxu1 %v1374_v32 }
 0x58e   :  { %556 = vmatprep.subr.bf16.mxu1 %v1469_v33 }
 0x591   :  { %557 = vmatpush1.bf16.msra.mxu1 %v1476_v34 }
 0x592   :  { %558 = vmatprep.subr.bf16.mxu1 %v1483_v35 }
 0x595   :  { %559 = vmatpush1.bf16.msra.mxu1 %v1495_v37 }
 0x596   :  { %767 = vmatprep.subr.bf16.mxu1 %v1452_v30 }
 0x648   :  { %v364_v27 = vpop.f32.mrf.mxu1 }
 0x649   :  { %v365_v28 = vadd.f32 %v364_v27, %v323_v25 }
 0x64a   :  { %v366_v29 = vpop.f32.mrf.mxu1 }
 0x64b   :  { %1256 = vtanh.f32 %v365_v28  ;;  %v367_v36 = vadd.f32 %v366_v29, %v324_v26  ;;  %v1132_v42 = vmul.f32 -1.442695, %v365_v28 }
 0x64c   :  { %v368_v38 = vpop.f32.mrf.mxu1 }
 0x64d   :  { %1258 = vtanh.f32 %v367_v36  ;;  %v1133_v43 = vmul.f32 -1.442695, %v367_v36 }
 0x64e   :  { %v369_v39 = vpop.f32.mrf.mxu1  ;;  %1260 = vpow2.f32 %v1132_v42 }
 0x64f   :  { %1262 = vpow2.f32 %v1133_v43 }
 0x658   :  { %v1257_v40 = vpop.eup %1256 }
 0x659   :  { %387 = vrot.lane.b32.xlu1 %v1257_v40, %s1373_s3 }
 0x65a   :  { %v1259_v41 = vpop.eup %1258 }
 0x65b   :  { %398 = vrot.lane.b32.xlu0 %v1259_v41, %s1373_s3  ;;  %v1261_v45 = vpop.eup %1260 }
 0x65c   :  { %v1263_v47 = vpop.eup %1262  ;;  %v377_v48 = vadd.f32 1.0, %v1261_v45 }
 0x65d   :  { %v378_v49 = vadd.f32 1.0, %v1263_v47 }
 0x65e   :  { %1264 = vrcp.f32 %v377_v48 }
 0x65f   :  { %1266 = vrcp.f32 %v378_v49 }
 0x66b   :  { %v1265_v50 = vpop.eup %1264 }
 0x66c   :  { %v1267_v53 = vpop.eup %1266  ;;  %v385_v56 = vmul.f32 %v1265_v50, %v1525_v7 }
 0x66d   :  { %v396_v60 = vmul.f32 %v1267_v53, %v1529_v10  ;;  %v432_v10 = vrot.slane %v1442_v18, 6 }
 0x6cb   :  { %v388_v51 = vpop.permute.xlu1 %387 }
 0x6cc   :  { %v390_v52 = vmul.f32 %v1265_v50, %v388_v51 }
 0x6cd   :  { %v399_v54 = vpop.permute.xlu0 %398 }
 0x6ce   :  { %392 = vrot.lane.b32.xlu1 %v390_v52, %s1376_s15  ;;  %v401_v55 = vmul.f32 %v1267_v53, %v399_v54 }
 0x6d0   :  { %403 = vrot.lane.b32.xlu0 %v401_v55, %s1376_s15 }
 0x740   :  { %v393_v57 = vpop.permute.xlu1 %392 }
 0x741   :  { %v1557_v58 = vadd.f32 %v393_v57, %v385_v56 }
 0x742   :  { %v404_v59 = vpop.permute.xlu0 %403 }
 0x743   :  { %408 = vrot.lane.b32.xlu1 %v1557_v58, %s1375_s14  ;;  %v1562_v61 = vadd.f32 %v404_v59, %v396_v60 }
 0x7b5   :  { %v409_v62 = vpop.permute.xlu1 %408 }
 0x7b6   :  { %v411_v63 = vsel %vm205_vm1, %v409_v62, %v1562_v61 }
 0x7b7   :  { %1268 = vtanh.f32 %v411_v63 }
 0x7c4   :  { %v1269_v0 = vpop.eup %1268 }
 0x7c5   :  { %418 = vrot.lane.b32.xlu1 %v1269_v0, %s1373_s3  ;;  %414 = vrot.lane.b32.xlu0 %v1269_v0, %s1375_s14 }
 0x837   :  { %v419_v2 = vpop.permute.xlu1 %418  ;;  %v415_v3 = vpop.permute.xlu0 %414 }
 0x838   :  { %v421_v4 = vmul.f32 %v1267_v53, %v419_v2  ;;  %v417_v5 = vmul.f32 %v1265_v50, %v415_v3 }
 0x83a   :  { %427 = vrot.lane.b32.xlu1 %v421_v4, %s1373_s3  ;;  %423 = vrot.lane.b32.xlu0 %v417_v5, %s1376_s15 }
 0x8ac   :  { %v428_v6 = vpop.permute.xlu1 %427  ;;  %v424_v7 = vpop.permute.xlu0 %423 }
 0x8ad   :  { %v430_v8 = vsel %vm205_vm1, %v424_v7, %v428_v6 }
 0x8ae   :  { %v431_v9 = vpack.c.bf16 %v430_v8, %v430_v8 }
 0x8b0   :  { %1134 = vmatmul.mubr.msk.bf16.vlgmr.msra.gmra.mxu0 %vm213_vm2, %v431_v9 }
 0x8b1   :  { %661 = vmatpush1.bf16.msra.mxu0 %v1374_v32  ;;  %684 = vmatprep.mubr.bf16.mxu0 %v1374_v32 }
 0x8b2   :  { %662 = vmatprep.subr.bf16.mxu0 %v1457_v31 }
 0x8b5   :  { %663 = vmatpush1.bf16.msra.mxu0 %v1374_v32 }
 0x8b6   :  { %664 = vmatprep.subr.bf16.mxu0 %v1469_v33 }
 0x8b9   :  { %665 = vmatpush1.bf16.msra.mxu0 %v1476_v34 }
 0x8ba   :  { %666 = vmatprep.subr.bf16.mxu0 %v1483_v35 }
 0x8bd   :  { %667 = vmatpush1.bf16.msra.mxu0 %v1495_v37 }
 0x8be   :  { %874 = vmatprep.subr.bf16.mxu0 %v1452_v30 }
 0x970   :  { %v473_v12 = vpop.f32.mrf.mxu0 }
 0x971   :  { %v474_v14 = vadd.f32 %v473_v12, %v432_v10 }
 0x972   :  { %v475_v15 = vpop.f32.mrf.mxu0 }
 0x973   :  { %1270 = vtanh.f32 %v474_v14  ;;  %v476_v16 = vadd.f32 %v475_v15, %v433_v11  ;;  %v1135_v23 = vmul.f32 -1.442695, %v474_v14 }
 0x974   :  { %v477_v17 = vpop.f32.mrf.mxu0 }
 0x975   :  { %1272 = vtanh.f32 %v476_v16  ;;  %v1136_v18 = vmul.f32 -1.442695, %v476_v16 }
 0x976   :  { %v478_v19 = vpop.f32.mrf.mxu0  ;;  %1274 = vpow2.f32 %v1135_v23 }
 0x977   :  { %1276 = vpow2.f32 %v1136_v18 }
 0x980   :  { %v1271_v20 = vpop.eup %1270 }
 0x981   :  { %496 = vrot.lane.b32.xlu0 %v1271_v20, %s1373_s3 }
 0x982   :  { %v1273_v22 = vpop.eup %1272 }
 0x983   :  { %507 = vrot.lane.b32.xlu1 %v1273_v22, %s1373_s3  ;;  %v1275_v24 = vpop.eup %1274 }
 0x984   :  { %v1277_v25 = vpop.eup %1276  ;;  %v486_v27 = vadd.f32 1.0, %v1275_v24 }
 0x985   :  { %v487_v28 = vadd.f32 1.0, %v1277_v25 }
 0x986   :  { %1278 = vrcp.f32 %v486_v27 }
 0x987   :  { %1280 = vrcp.f32 %v487_v28 }
 0x993   :  { %v1279_v29 = vpop.eup %1278 }
 0x994   :  { %v1281_v39 = vpop.eup %1280  ;;  %v494_v42 = vmul.f32 %v1279_v29, %v1557_v58 }
 0x995   :  { %v505_v48 = vmul.f32 %v1281_v39, %v1562_v61 }
 0x9f3   :  { %v497_v36 = vpop.permute.xlu0 %496 }
 0x9f4   :  { %v499_v38 = vmul.f32 %v1279_v29, %v497_v36 }
 0x9f5   :  { %v508_v40 = vpop.permute.xlu1 %507 }
 0x9f6   :  { %501 = vrot.lane.b32.xlu0 %v499_v38, %s1376_s15  ;;  %v510_v41 = vmul.f32 %v1281_v39, %v508_v40 }
 0x9f8   :  { %512 = vrot.lane.b32.xlu1 %v510_v41, %s1376_s15 }
 0xa68   :  { %v502_v43 = vpop.permute.xlu0 %501 }
 0xa69   :  { %v504_v45 = vadd.f32 %v502_v43, %v494_v42 }
 0xa6a   :  { %v513_v47 = vpop.permute.xlu1 %512 }
 0xa6b   :  { %517 = vrot.lane.b32.xlu0 %v504_v45, %s1375_s14  ;;  %v515_v49 = vadd.f32 %v513_v47, %v505_v48  ;;  %v647_v48 = vrot.slane %v1445_v21, 2 }
 0xadd   :  { %v518_v50 = vpop.permute.xlu0 %517 }
 0xade   :  { %v520_v51 = vsel %vm205_vm1, %v518_v50, %v515_v49 }
 0xadf   :  { %1282 = vtanh.f32 %v520_v51 }
 0xaec   :  { %v1283_v52 = vpop.eup %1282 }
 0xaed   :  { %527 = vrot.lane.b32.xlu0 %v1283_v52, %s1373_s3  ;;  %523 = vrot.lane.b32.xlu1 %v1283_v52, %s1375_s14 }
 0xb5f   :  { %v528_v53 = vpop.permute.xlu0 %527  ;;  %v524_v54 = vpop.permute.xlu1 %523 }
 0xb60   :  { %v530_v55 = vmul.f32 %v1281_v39, %v528_v53  ;;  %v526_v56 = vmul.f32 %v1279_v29, %v524_v54 }
 0xb62   :  { %536 = vrot.lane.b32.xlu0 %v530_v55, %s1373_s3  ;;  %532 = vrot.lane.b32.xlu1 %v526_v56, %s1376_s15 }
 0xbd4   :  { %v537_v57 = vpop.permute.xlu0 %536  ;;  %v533_v58 = vpop.permute.xlu1 %532 }
 0xbd5   :  { %v539_v59 = vsel %vm205_vm1, %v533_v58, %v537_v57 }
 0xbd6   :  { %v540_v60 = vpack.c.bf16 %v539_v59, %v539_v59 }
 0xbd8   :  { %1137 = vmatmul.mubr.msk.bf16.vlgmr.msra.gmra.mxu1 %vm213_vm2, %v540_v60 }
 0xbd9   :  { %768 = vmatpush1.bf16.msra.mxu1 %v1374_v32  ;;  %791 = vmatprep.mubr.bf16.mxu1 %v1374_v32 }
 0xbda   :  { %769 = vmatprep.subr.bf16.mxu1 %v1457_v31 }
 0xbdd   :  { %770 = vmatpush1.bf16.msra.mxu1 %v1374_v32 }
 0xbde   :  { %771 = vmatprep.subr.bf16.mxu1 %v1469_v33 }
 0xbe1   :  { %772 = vmatpush1.bf16.msra.mxu1 %v1476_v34 }
 0xbe2   :  { %773 = vmatprep.subr.bf16.mxu1 %v1483_v35 }
 0xbe5   :  { %774 = vmatpush1.bf16.msra.mxu1 %v1495_v37 }
 0xbe6   :  { %1191 = vmatprep.subr.bf16.mxu1 %v1371_v1 }
 0xc98   :  { %v578_v61 = vpop.f32.mrf.mxu1 }
 0xc99   :  { %v579_v62 = vadd.f32 %v578_v61, %v1445_v21 }
 0xc9a   :  { %v580_v63 = vpop.f32.mrf.mxu1 }
 0xc9b   :  { %1284 = vtanh.f32 %v579_v62  ;;  %v581_v0 = vadd.f32 %v580_v63, %v1515_v44  ;;  %v1138_v6 = vmul.f32 -1.442695, %v579_v62 }
 0xc9c   :  { %v582_v2 = vpop.f32.mrf.mxu1 }
 0xc9d   :  { %1286 = vtanh.f32 %v581_v0  ;;  %v1139_v7 = vmul.f32 -1.442695, %v581_v0 }
 0xc9e   :  { %v583_v3 = vpop.f32.mrf.mxu1  ;;  %1288 = vpow2.f32 %v1138_v6 }
 0xc9f   :  { %1290 = vpow2.f32 %v1139_v7 }
 0xca8   :  { %v1285_v4 = vpop.eup %1284 }
 0xca9   :  { %601 = vrot.lane.b32.xlu1 %v1285_v4, %s1373_s3 }
 0xcaa   :  { %v1287_v5 = vpop.eup %1286 }
 0xcab   :  { %612 = vrot.lane.b32.xlu0 %v1287_v5, %s1373_s3  ;;  %v1289_v8 = vpop.eup %1288 }
 0xcac   :  { %v1291_v9 = vpop.eup %1290  ;;  %v591_v10 = vadd.f32 1.0, %v1289_v8 }
 0xcad   :  { %v592_v12 = vadd.f32 1.0, %v1291_v9 }
 0xcae   :  { %1292 = vrcp.f32 %v591_v10 }
 0xcaf   :  { %1294 = vrcp.f32 %v592_v12 }
 0xcbb   :  { %v1293_v14 = vpop.eup %1292 }
 0xcbc   :  { %v1295_v17 = vpop.eup %1294  ;;  %v599_v22 = vmul.f32 %v1293_v14, %v504_v45 }
 0xcbd   :  { %v610_v25 = vmul.f32 %v1295_v17, %v515_v49 }
 0xd1b   :  { %v602_v15 = vpop.permute.xlu1 %601 }
 0xd1c   :  { %v604_v16 = vmul.f32 %v1293_v14, %v602_v15 }
 0xd1d   :  { %v613_v19 = vpop.permute.xlu0 %612 }
 0xd1e   :  { %606 = vrot.lane.b32.xlu1 %v604_v16, %s1376_s15  ;;  %v615_v20 = vmul.f32 %v1295_v17, %v613_v19 }
 0xd20   :  { %617 = vrot.lane.b32.xlu0 %v615_v20, %s1376_s15 }
 0xd90   :  { %v607_v23 = vpop.permute.xlu1 %606 }
 0xd91   :  { %v609_v18 = vadd.f32 %v607_v23, %v599_v22  ;;  %v754_v23 = vrot.slane %v1445_v21, 4 }
 0xd92   :  { %v618_v24 = vpop.permute.xlu0 %617 }
 0xd93   :  { %622 = vrot.lane.b32.xlu1 %v609_v18, %s1375_s14  ;;  %v1615_v27 = vadd.f32 %v618_v24, %v610_v25 }
 0xe05   :  { %v623_v28 = vpop.permute.xlu1 %622 }
 0xe06   :  { %v625_v29 = vsel %vm205_vm1, %v623_v28, %v1615_v27 }
 0xe07   :  { %1296 = vtanh.f32 %v625_v29 }
 0xe14   :  { %v1297_v36 = vpop.eup %1296 }
 0xe15   :  { %632 = vrot.lane.b32.xlu1 %v1297_v36, %s1373_s3  ;;  %628 = vrot.lane.b32.xlu0 %v1297_v36, %s1375_s14 }
 0xe87   :  { %v633_v38 = vpop.permute.xlu1 %632  ;;  %v629_v39 = vpop.permute.xlu0 %628 }
 0xe88   :  { %v635_v40 = vmul.f32 %v1295_v17, %v633_v38  ;;  %v631_v41 = vmul.f32 %v1293_v14, %v629_v39 }
 0xe8a   :  { %641 = vrot.lane.b32.xlu1 %v635_v40, %s1373_s3  ;;  %637 = vrot.lane.b32.xlu0 %v631_v41, %s1376_s15 }
 0xefc   :  { %v642_v42 = vpop.permute.xlu1 %641  ;;  %v638_v43 = vpop.permute.xlu0 %637 }
 0xefd   :  { %v644_v45 = vsel %vm205_vm1, %v638_v43, %v642_v42 }
 0xefe   :  { %v645_v47 = vpack.c.bf16 %v644_v45, %v644_v45 }
 0xf00   :  { %1140 = vmatmul.mubr.msk.bf16.vlgmr.msra.gmra.mxu0 %vm213_vm2, %v645_v47 }
 0xf01   :  { %875 = vmatpush1.bf16.msra.mxu0 %v1374_v32  ;;  %898 = vmatprep.mubr.bf16.mxu0 %v1374_v32 }
 0xf02   :  { %876 = vmatprep.subr.bf16.mxu0 %v1457_v31 }
 0xf05   :  { %877 = vmatpush1.bf16.msra.mxu0 %v1374_v32 }
 0xf06   :  { %878 = vmatprep.subr.bf16.mxu0 %v1469_v33 }
 0xf09   :  { %879 = vmatpush1.bf16.msra.mxu0 %v1476_v34 }
 0xf0a   :  { %880 = vmatprep.subr.bf16.mxu0 %v1483_v35 }
 0xf0d   :  { %881 = vmatpush1.bf16.msra.mxu0 %v1495_v37 }
 0xf0e   :  { %1203 = vmatprep.subr.bf16.mxu0 %v1371_v1 }
 0xfc0   :  { %v686_v49 = vpop.f32.mrf.mxu0 }
 0xfc1   :  { %v687_v50 = vadd.f32 %v686_v49, %v647_v48 }
 0xfc2   :  { %v688_v51 = vpop.f32.mrf.mxu0 }
 0xfc3   :  { %1298 = vtanh.f32 %v687_v50  ;;  %v689_v52 = vadd.f32 %v688_v51, %v210_v46  ;;  %v1141_v37 = vmul.f32 -1.442695, %v687_v50 }
 0xfc4   :  { %v690_v32 = vpop.f32.mrf.mxu0 }
 0xfc5   :  { %1300 = vtanh.f32 %v689_v52  ;;  %v1142_v55 = vmul.f32 -1.442695, %v689_v52 }
 0xfc6   :  { %v691_v53 = vpop.f32.mrf.mxu0  ;;  %1302 = vpow2.f32 %v1141_v37 }
 0xfc7   :  { %1304 = vpow2.f32 %v1142_v55 }
 0xfd0   :  { %v1299_v54 = vpop.eup %1298 }
 0xfd1   :  { %709 = vrot.lane.b32.xlu0 %v1299_v54, %s1373_s3 }
 0xfd2   :  { %v1301_v34 = vpop.eup %1300 }
 0xfd3   :  { %720 = vrot.lane.b32.xlu1 %v1301_v34, %s1373_s3  ;;  %v1303_v56 = vpop.eup %1302 }
 0xfd4   :  { %v1305_v57 = vpop.eup %1304  ;;  %v699_v58 = vadd.f32 1.0, %v1303_v56 }
 0xfd5   :  { %v700_v59 = vadd.f32 1.0, %v1305_v57 }
 0xfd6   :  { %1306 = vrcp.f32 %v699_v58 }
 0xfd7   :  { %1308 = vrcp.f32 %v700_v59 }
 0xfe3   :  { %v1307_v46 = vpop.eup %1306 }
 0xfe4   :  { %v1309_v62 = vpop.eup %1308  ;;  %v707_v2 = vmul.f32 %v1307_v46, %v609_v18 }
 0xfe5   :  { %v718_v6 = vmul.f32 %v1309_v62, %v1615_v27 }
0x1043   :  { %v710_v60 = vpop.permute.xlu0 %709 }
0x1044   :  { %v712_v61 = vmul.f32 %v1307_v46, %v710_v60 }
0x1045   :  { %v721_v63 = vpop.permute.xlu1 %720 }
0x1046   :  { %714 = vrot.lane.b32.xlu0 %v712_v61, %s1376_s15  ;;  %v723_v0 = vmul.f32 %v1309_v62, %v721_v63  ;;  %v861_v61 = vrot.slane %v1445_v21, 6 }
0x1048   :  { %725 = vrot.lane.b32.xlu1 %v723_v0, %s1376_s15 }
0x10b8   :  { %v715_v3 = vpop.permute.xlu0 %714 }
0x10b9   :  { %v717_v4 = vadd.f32 %v715_v3, %v707_v2 }
0x10ba   :  { %v726_v5 = vpop.permute.xlu1 %725 }
0x10bb   :  { %730 = vrot.lane.b32.xlu0 %v717_v4, %s1375_s14  ;;  %v728_v7 = vadd.f32 %v726_v5, %v718_v6 }
0x112d   :  { %v731_v8 = vpop.permute.xlu0 %730 }
0x112e   :  { %v733_v9 = vsel %vm205_vm1, %v731_v8, %v728_v7 }
0x112f   :  { %1310 = vtanh.f32 %v733_v9 }
0x113c   :  { %v1311_v10 = vpop.eup %1310 }
0x113d   :  { %740 = vrot.lane.b32.xlu0 %v1311_v10, %s1373_s3  ;;  %736 = vrot.lane.b32.xlu1 %v1311_v10, %s1375_s14 }
0x11af   :  { %v741_v12 = vpop.permute.xlu0 %740  ;;  %v737_v14 = vpop.permute.xlu1 %736 }
0x11b0   :  { %v743_v15 = vmul.f32 %v1309_v62, %v741_v12  ;;  %v739_v16 = vmul.f32 %v1307_v46, %v737_v14 }
0x11b2   :  { %749 = vrot.lane.b32.xlu0 %v743_v15, %s1373_s3  ;;  %745 = vrot.lane.b32.xlu1 %v739_v16, %s1376_s15 }
0x1224   :  { %v750_v17 = vpop.permute.xlu0 %749  ;;  %v746_v19 = vpop.permute.xlu1 %745 }
0x1225   :  { %v752_v20 = vsel %vm205_vm1, %v746_v19, %v750_v17 }
0x1226   :  { %v753_v22 = vpack.c.bf16 %v752_v20, %v752_v20 }
0x1228   :  { %1143 = vmatmul.mubr.msk.bf16.vlgmr.msra.gmra.mxu1 %vm213_vm2, %v753_v22 }
0x1229   :  { %1192 = vmatpush3.bf16.msra.mxu1 %v1452_v30  ;;  %1199 = vmatprep.mubr.msk.bf16.mxu1 %vm1372_vm0, %v1371_v1 }
0x122a   :  { %1193 = vmatprep.subr.bf16.mxu1 %v1371_v1 }
0x122d   :  { %1194 = vmatpush3.bf16.msra.mxu1 %v1457_v31 }
0x122e   :  { %1195 = vmatprep.subr.bf16.mxu1 %v1371_v1 }
0x1231   :  { %1196 = vmatpush3.bf16.msra.mxu1 %v1469_v33 }
0x1232   :  { %1197 = vmatprep.subr.bf16.mxu1 %v1371_v1 }
0x1235   :  { %1198 = vmatpush3.bf16.msra.mxu1 %v1483_v35 }
0x12e8   :  { %v793_v18 = vpop.f32.mrf.mxu1 }
0x12e9   :  { %v794_v24 = vadd.f32 %v793_v18, %v754_v23 }
0x12ea   :  { %v795_v30 = vpop.f32.mrf.mxu1 }
0x12eb   :  { %1312 = vtanh.f32 %v794_v24  ;;  %v796_v25 = vadd.f32 %v795_v30, %v324_v26  ;;  %v1144_v29 = vmul.f32 -1.442695, %v794_v24 }
0x12ec   :  { %v797_v27 = vpop.f32.mrf.mxu1 }
0x12ed   :  { %1314 = vtanh.f32 %v796_v25  ;;  %v1145_v35 = vmul.f32 -1.442695, %v796_v25 }
0x12ee   :  { %v798_v31 = vpop.f32.mrf.mxu1  ;;  %1316 = vpow2.f32 %v1144_v29 }
0x12ef   :  { %1318 = vpow2.f32 %v1145_v35 }
0x12f8   :  { %v1313_v28 = vpop.eup %1312 }
0x12f9   :  { %816 = vrot.lane.b32.xlu1 %v1313_v28, %s1373_s3 }
0x12fa   :  { %v1315_v33 = vpop.eup %1314 }
0x12fb   :  { %827 = vrot.lane.b32.xlu0 %v1315_v33, %s1373_s3  ;;  %v1317_v36 = vpop.eup %1316 }
0x12fc   :  { %v1319_v38 = vpop.eup %1318  ;;  %v806_v39 = vadd.f32 1.0, %v1317_v36 }
0x12fd   :  { %v807_v40 = vadd.f32 1.0, %v1319_v38 }
0x12fe   :  { %1320 = vrcp.f32 %v806_v39 }
0x12ff   :  { %1322 = vrcp.f32 %v807_v40 }
0x130b   :  { %v1321_v26 = vpop.eup %1320 }
0x130c   :  { %v1323_v43 = vpop.eup %1322  ;;  %v814_v48 = vmul.f32 %v1321_v26, %v717_v4 }
0x130d   :  { %v825_v52 = vmul.f32 %v1323_v43, %v728_v7 }
0x136b   :  { %v817_v41 = vpop.permute.xlu1 %816 }
0x136c   :  { %v819_v42 = vmul.f32 %v1321_v26, %v817_v41 }
0x136d   :  { %v828_v45 = vpop.permute.xlu0 %827 }
0x136e   :  { %821 = vrot.lane.b32.xlu1 %v819_v42, %s1376_s15  ;;  %v830_v47 = vmul.f32 %v1323_v43, %v828_v45 }
0x1370   :  { %832 = vrot.lane.b32.xlu0 %v830_v47, %s1376_s15 }
0x13e0   :  { %v822_v49 = vpop.permute.xlu1 %821 }
0x13e1   :  { %v824_v50 = vadd.f32 %v822_v49, %v814_v48 }
0x13e2   :  { %v833_v51 = vpop.permute.xlu0 %832 }
0x13e3   :  { %837 = vrot.lane.b32.xlu1 %v824_v50, %s1375_s14  ;;  %v835_v32 = vadd.f32 %v833_v51, %v825_v52 }
0x1455   :  { %v838_v53 = vpop.permute.xlu1 %837 }
0x1456   :  { %v840_v54 = vsel %vm205_vm1, %v838_v53, %v835_v32 }
0x1457   :  { %1324 = vtanh.f32 %v840_v54 }
0x1464   :  { %v1325_v34 = vpop.eup %1324 }
0x1465   :  { %847 = vrot.lane.b32.xlu1 %v1325_v34, %s1373_s3  ;;  %843 = vrot.lane.b32.xlu0 %v1325_v34, %s1375_s14  ;;  %v1232_v34 = vld [vmem:[%s1712_s1 + $0x78] sm:$0xff]  }
0x14d7   :  { %v848_v37 = vpop.permute.xlu1 %847  ;;  %v844_v55 = vpop.permute.xlu0 %843 }
0x14d8   :  { %v850_v56 = vmul.f32 %v1323_v43, %v848_v37  ;;  %v846_v57 = vmul.f32 %v1321_v26, %v844_v55  ;;  %v1233_v37 = vld [vmem:[%s1712_s1 + $0x70] sm:$0xff]   ;;  %s1377_s1 = smov [#allocation2]  }
0x14d9   :  { %s1105_s24 = sshll.u32 %s1377_s1, 4  ;;  %s1106_s24 = int_to_ptr.vmem [resolvable:$true] %s1105_s24 }
0x14da   :  { %856 = vrot.lane.b32.xlu1 %v850_v56, %s1373_s3  ;;  %852 = vrot.lane.b32.xlu0 %v846_v57, %s1376_s15  ;;  %s1349_s25 = scalar_lea.vmem %s1106_s24, 32  ;;  %p1354_p1 = scmp.lt.s32.totalorder %s1106_s24, %s1106_s24 }
0x14db   :  { %p1350_p0 = scmp.ne.s32.totalorder %s1106_s24, %s1349_s25  ;;  %p1355_p2 = scmp.lt.s32.totalorder %s1349_s25, %s1349_s25 }
0x14dd   :  { %p1356_p3 = por %p1355_p2, %p1354_p1 }
0x14df   :  { %p1357_p4 = pnand %p1356_p3, %p1350_p0 }
0x154c   :  { %v857_v58 = vpop.permute.xlu1 %856  ;;  %v853_v59 = vpop.permute.xlu0 %852 }
0x154d   :  { %v859_v46 = vsel %vm205_vm1, %v853_v59, %v857_v58 }
0x154e   :  { %v860_v60 = vpack.c.bf16 %v859_v46, %v859_v46  ;;  %v1038_v46 = vsub.s32 2, %v1433_v13 }
0x1550   :  { %1146 = vmatmul.mubr.msk.bf16.vlgmr.msra.gmra.mxu0 %vm213_vm2, %v860_v60  ;;  %v1348_v60 = vld [vmem:[%s1711_s0 + $0x10] sm:$0x7] }
0x1551   :  { %1207 = vmatprep.mubr.msk.bf16.mxu0 %vm1372_vm0, %v1371_v1  ;;  %1204 = vmatpush3.bf16.msra.mxu0 %v1232_v34 }
0x1552   :  { %1205 = vmatprep.subr.bf16.mxu0 %v1371_v1 }
0x1555   :  { %1206 = vmatpush3.bf16.msra.mxu0 %v1233_v37 }
0x1610   :  { %v900_v62 = vpop.f32.mrf.mxu0 }
0x1611   :  { %v901_v63 = vadd.f32 %v900_v62, %v861_v61  ;;  %v1039_v61 = vrot.slane %v1348_v60, %v1038_v46 }
0x1612   :  { %v902_v0 = vpop.f32.mrf.mxu0 }
0x1613   :  { %1326 = vtanh.f32 %v901_v63  ;;  %v903_v2 = vadd.f32 %v902_v0, %v433_v11  ;;  %v1147_v7 = vmul.f32 -1.442695, %v901_v63 }
0x1614   :  { %v904_v3 = vpop.f32.mrf.mxu0 }
0x1615   :  { %1328 = vtanh.f32 %v903_v2  ;;  %v1148_v8 = vmul.f32 -1.442695, %v903_v2 }
0x1616   :  { %v905_v4 = vpop.f32.mrf.mxu0  ;;  %1330 = vpow2.f32 %v1147_v7 }
0x1617   :  { %1332 = vpow2.f32 %v1148_v8 }
0x1620   :  { %v1327_v5 = vpop.eup %1326 }
0x1621   :  { %923 = vrot.lane.b32.xlu0 %v1327_v5, %s1373_s3 }
0x1622   :  { %v1329_v6 = vpop.eup %1328 }
0x1623   :  { %934 = vrot.lane.b32.xlu1 %v1329_v6, %s1373_s3  ;;  %v1331_v21 = vpop.eup %1330 }
0x1624   :  { %v1333_v9 = vpop.eup %1332  ;;  %v913_v10 = vadd.f32 1.0, %v1331_v21 }
0x1625   :  { %v914_v12 = vadd.f32 1.0, %v1333_v9 }
0x1626   :  { %1334 = vrcp.f32 %v913_v10 }
0x1627   :  { %1336 = vrcp.f32 %v914_v12 }
0x1633   :  { %v1335_v11 = vpop.eup %1334 }
0x1634   :  { %v1337_v16 = vpop.eup %1336  ;;  %v921_v20 = vmul.f32 %v1335_v11, %v824_v50 }
0x1635   :  { %v932_v24 = vmul.f32 %v1337_v16, %v835_v32 }
0x1693   :  { %v924_v14 = vpop.permute.xlu0 %923 }
0x1694   :  { %v926_v15 = vmul.f32 %v1335_v11, %v924_v14 }
0x1695   :  { %v935_v17 = vpop.permute.xlu1 %934 }
0x1696   :  { %928 = vrot.lane.b32.xlu0 %v926_v15, %s1376_s15  ;;  %v937_v19 = vmul.f32 %v1337_v16, %v935_v17 }
0x1698   :  { %939 = vrot.lane.b32.xlu1 %v937_v19, %s1376_s15 }
0x1708   :  { %v929_v22 = vpop.permute.xlu0 %928 }
0x1709   :  { %v931_v23 = vadd.f32 %v929_v22, %v921_v20 }
0x170a   :  { %v940_v18 = vpop.permute.xlu1 %939 }
0x170b   :  { %944 = vrot.lane.b32.xlu0 %v931_v23, %s1375_s14  ;;  %v942_v30 = vadd.f32 %v940_v18, %v932_v24 }
0x177d   :  { %v945_v25 = vpop.permute.xlu0 %944 }
0x177e   :  { %v947_v27 = vsel %vm205_vm1, %v945_v25, %v942_v30 }
0x177f   :  { %1338 = vtanh.f32 %v947_v27 }
0x178c   :  { %v1339_v31 = vpop.eup %1338 }
0x178d   :  { %954 = vrot.lane.b32.xlu0 %v1339_v31, %s1373_s3  ;;  %950 = vrot.lane.b32.xlu1 %v1339_v31, %s1375_s14 }
0x17ff   :  { %v955_v28 = vpop.permute.xlu0 %954  ;;  %v951_v33 = vpop.permute.xlu1 %950 }
0x1800   :  { %v957_v29 = vmul.f32 %v1337_v16, %v955_v28  ;;  %v953_v35 = vmul.f32 %v1335_v11, %v951_v33 }
0x1802   :  { %963 = vrot.lane.b32.xlu0 %v957_v29, %s1373_s3  ;;  %959 = vrot.lane.b32.xlu1 %v953_v35, %s1376_s15 }
0x1874   :  { %v964_v36 = vpop.permute.xlu0 %963  ;;  %v960_v38 = vpop.permute.xlu1 %959 }
0x1875   :  { %v966_v39 = vsel %vm205_vm1, %v960_v38, %v964_v36 }
0x1876   :  { %v967_v40 = vpack.c.bf16 %v966_v39, %v966_v39 }
0x1878   :  { %1200 = vmatmul.mubr.msk.bf16.vlgmr.msra.gmra.mxu1 %vm213_vm2, %v967_v40 }
0x1938   :  { %v1005_v26 = vpop.f32.mrf.mxu1 }
0x1939   :  { %v1006_v41 = vadd.f32 %v1005_v26, %v1515_v44 }
0x193a   :  { %v1201_v42 = vpop.f32.mrf.mxu1 }
0x193b   :  { %1340 = vtanh.f32 %v1006_v41  ;;  %v1150_v48 = vmul.f32 -1.442695, %v1006_v41 }
0x193c   :  { %v1008_v43 = vpop.f32.mrf.mxu1 }
0x193d   :  { %1342 = vpow2.f32 %v1150_v48 }
0x193e   :  { %v1202_v45 = vpop.f32.mrf.mxu1 }
0x1948   :  { %v1341_v47 = vpop.eup %1340 }
0x1949   :  { %1020 = vrot.lane.b32.xlu1 %v1341_v47, %s1373_s3 }
0x194a   :  { %v1343_v49 = vpop.eup %1342 }
0x194b   :  { %v1014_v50 = vadd.f32 1.0, %v1343_v49 }
0x194d   :  { %1344 = vrcp.f32 %v1014_v50 }
0x195a   :  { %v1345_v51 = vpop.eup %1344 }
0x195b   :  { %v1018_v53 = vmul.f32 %v1345_v51, %v942_v30 }
0x19bb   :  { %v1021_v52 = vpop.permute.xlu1 %1020 }
0x19bc   :  { %v1023_v32 = vmul.f32 %v1345_v51, %v1021_v52 }
0x19be   :  { %1025 = vrot.lane.b32.xlu0 %v1023_v32, %s1376_s15 }
0x1a30   :  { %v1026_v54 = vpop.permute.xlu0 %1025 }
0x1a31   :  { %v1028_v44 = vadd.f32 %v1026_v54, %v1018_v53 }
0x1a33   :  { %1346 = vtanh.f32 %v1028_v44 }
0x1a40   :  { %v1347_v55 = vpop.eup %1346 }
0x1a41   :  { %1031 = vrot.lane.b32.xlu1 %v1347_v55, %s1373_s3 }
0x1ab3   :  { %v1032_v56 = vpop.permute.xlu1 %1031 }
0x1ab4   :  { %v1034_v57 = vmul.f32 %v1345_v51, %v1032_v56 }
0x1ab6   :  { %v1035_v58 = vpack.c.bf16 %v1034_v57, %v1034_v57 }
0x1ab8   :  { %1041 = vrot.lane.b32.xlu0 %v1035_v58, %s1376_s15 }
0x1b2a   :  { %v1042_v59 = vpop.permute.xlu0 %1041 }
0x1b2b   :  { %1208 = vmatmul.mubr.msk.bf16.vlgmr.msra.gmra.mxu0 %vm205_vm1, %v1042_v59 }
0x1beb   :  { %v1092_v1 = vpop.f32.mrf.mxu0 }
0x1bec   :  { %v1093_v62 = vadd.f32 %v1092_v1, %v1039_v61 }
0x1bed   :  { %v1209_v63 = vpop.f32.mrf.mxu0 }
0x1bee   :  { %1098 = vst [vmem:[#allocation2] sm:$0x3] %v1093_v62 }
0x1bef   :  { %v1095_v0 = vpop.f32.mrf.mxu0 }
0x1bf0   :  { %1360 = shalt.err (!%p1357_p4)
}
0x1bf1   :  { %1108 = dma.vmem_to_hbm [thread:$0]  %s1106_s24, 32, %s1713_s2, [#allocation3]   ;;  %v1210_v13 = vpop.f32.mrf.mxu0 }
0x1bf2   :  { %1369 = dma.done.wait [#allocation3], 32  }
0x1bf3   :  { %1370 = vsyncadd [#allocation3], 4294967264 }
0x1bf4   :  { %1112 = vsyncpa [#allocation3], 1 }

</bundles_post_ra>
